<compile_context>
chip_gen: v7x
topology: tpu7x:2x2x1
jax: 0.10.0
libtpu: 0.0.40
codegen_flags: <defaults>
</compile_context>

<pallas_src>
import math

import jax
import jax.numpy as jnp
from jax.experimental import pallas as pl
from jax.experimental.pallas import tpu as pltpu


# ---------------------------------------------------------------------------
# Kernels
# ---------------------------------------------------------------------------

def _swiglu_kernel_split(h_ref, gate_ref, o_ref):
    """Fast path: h and gate arrive as two separately-DMA'd lane-aligned tiles."""
    h = h_ref[...]
    gate = gate_ref[...].astype(jnp.float32)
    silu = gate * jax.nn.sigmoid(gate)  # exp on the EUP, mul on the VPU
    o_ref[...] = (h.astype(jnp.float32) * silu).astype(o_ref.dtype)


def _swiglu_kernel_fused(x_ref, o_ref):
    """Fallback path (D not a multiple of 128): whole feature axis in one block."""
    d = o_ref.shape[-1]
    h = x_ref[:, :d]
    gate = x_ref[:, d:].astype(jnp.float32)
    silu = gate * jax.nn.sigmoid(gate)
    o_ref[...] = (h.astype(jnp.float32) * silu).astype(o_ref.dtype)


# ---------------------------------------------------------------------------
# Wrapper
# ---------------------------------------------------------------------------

_VMEM_LIMIT_BYTES = 32 * 1024 * 1024      # explicit; safe on v5e / v6e / v7x
_VMEM_BUFFER_BUDGET = 24 * 1024 * 1024    # (2 in + 1 out) x 2 pipeline buffers
_DEFAULT_TILE_ROWS = 256                  # big enough to amortize grid-step cost


def _round_up(x, m):
    return (x + m - 1) // m * m


def _pick_tile_d(d):
    """Largest lane-aligned feature tile (multiple of 128) that divides d."""
    if d % 128 != 0:
        return None
    for cand in (2048, 1024, 512, 256, 128):
        if d % cand == 0:
            return cand
    return None


def swiglu(x, *, tile_rows=None, tile_d=None):
    """x: (..., 2*D) -> (..., D); identical semantics to torch chunk + silu."""
    orig_shape = x.shape
    two_d = orig_shape[-1]
    assert two_d % 2 == 0, "last dim must be even for SwiGLU"
    d = two_d // 2

    rows = math.prod(orig_shape[:-1]) if len(orig_shape) > 1 else 1
    x2 = x.reshape(rows, two_d)

    itemsize = jnp.dtype(x.dtype).itemsize
    row_align = max(8, 32 // itemsize)  # 8 for f32, 16 for bf16, 32 for 8-bit

    # Feature tiling (fast path only valid when D is a multiple of 128).
    if tile_d is None or d % tile_d != 0 or tile_d % 128 != 0:
        tile_d = _pick_tile_d(d)

    # Row tiling: aligned, capped to the (padded) row count.
    if tile_rows is None:
        tile_rows = _DEFAULT_TILE_ROWS
    tile_rows = max(row_align, tile_rows // row_align * row_align)
    tile_rows = min(tile_rows, _round_up(rows, row_align))

    # Keep the double-buffered pipeline (2 inputs + 1 output) within budget.
    feat = tile_d if tile_d is not None else d
    while tile_rows > row_align and 6 * tile_rows * feat * itemsize > _VMEM_BUFFER_BUDGET:
        tile_rows = max(row_align, (tile_rows // 2) // row_align * row_align)

    rows_padded = _round_up(rows, tile_rows)
    if rows_padded != rows:
        x2 = jnp.pad(x2, ((0, rows_padded - rows), (0, 0)))

    compiler_params = pltpu.CompilerParams(
        dimension_semantics=("parallel", "parallel") if tile_d is not None else ("parallel",),
        vmem_limit_bytes=_VMEM_LIMIT_BYTES,
    )

    if tile_d is not None:
        # Fast path: 2-D grid, x passed twice so h/gate halves are two
        # lane-aligned DMAs into the same HBM array (no wrapper-side copy).
        d_blocks = d // tile_d
        out = pl.pallas_call(
            _swiglu_kernel_split,
            out_shape=jax.ShapeDtypeStruct((rows_padded, d), x.dtype),
            grid_spec=pltpu.PrefetchScalarGridSpec(
                num_scalar_prefetch=0,
                grid=(rows_padded // tile_rows, d_blocks),
                in_specs=[
                    pl.BlockSpec((tile_rows, tile_d), lambda i, j: (i, j)),
                    pl.BlockSpec((tile_rows, tile_d), lambda i, j: (i, j + d_blocks)),
                ],
                out_specs=pl.BlockSpec((tile_rows, tile_d), lambda i, j: (i, j)),
            ),
            compiler_params=compiler_params,
        )(x2, x2)
    else:
        # Fallback: full feature axis per block (block dim == array dim).
        out = pl.pallas_call(
            _swiglu_kernel_fused,
            out_shape=jax.ShapeDtypeStruct((rows_padded, d), x.dtype),
            grid_spec=pltpu.PrefetchScalarGridSpec(
                num_scalar_prefetch=0,
                grid=(rows_padded // tile_rows,),
                in_specs=[pl.BlockSpec((tile_rows, two_d), lambda i: (i, 0))],
                out_specs=pl.BlockSpec((tile_rows, d), lambda i: (i, 0)),
            ),
            compiler_params=compiler_params,
        )(x2)

    if rows_padded != rows:
        out = out[:rows]
    return out.reshape(*orig_shape[:-1], d)


# ---------------------------------------------------------------------------
# Self-test
# ---------------------------------------------------------------------------

if __name__ == "__main__":
    def ref(x):
        h, gate = jnp.split(x, 2, axis=-1)
        return h * (gate * jax.nn.sigmoid(gate))

    key = jax.random.PRNGKey(0)
    k0, k1 = jax.random.split(key)

    # batch=2, seq=8, hidden=32 (D=16): exercises the fused fallback path.
    x_small = jax.random.normal(k0, (2, 8, 32), dtype=jnp.float32)
    y_small = jax.block_until_ready(swiglu(x_small))
    assert y_small.shape == (2, 8, 16)
    assert jnp.allclose(y_small, ref(x_small), atol=1e-6, rtol=1e-6)

    # Lane-aligned D=128 with non-tile-multiple rows: exercises the split
    # two-operand fast path (2-D grid) plus row padding.
    x_fast = jax.random.normal(k1, (3, 5, 256), dtype=jnp.float32)
    y_fast = jax.block_until_ready(swiglu(x_fast))
    assert y_fast.shape == (3, 5, 128)
    assert jnp.allclose(y_fast, ref(x_fast), atol=1e-6, rtol=1e-6)

    print("KERNEL_OK")
</pallas_src>

<mosaic_0001>
module attributes {stable_mosaic.version = 11 : i64} {
  func.func @_swiglu_kernel_fused(%arg0: i32, %arg1: memref<16x32xf32, #tpu.memory_space<vmem>>, %arg2: memref<16x16xf32, #tpu.memory_space<vmem>>) attributes {dimension_semantics = [#tpu.dimension_semantics<parallel>], iteration_bounds = array<i64: 1>, scalar_prefetch = 0 : i64, scratch_operands = 0 : i64, tpu.core_type = #tpu.core_type<tc>, window_params = [{transform_indices = @transform_0, window_bounds = array<i64: 16, 32>}, {transform_indices = @transform_1, window_bounds = array<i64: 16, 16>}]} {
    %c0 = arith.constant 0 : index
    %c0_0 = arith.constant 0 : index
    %0 = vector.load %arg1[%c0, %c0_0] : memref<16x32xf32, #tpu.memory_space<vmem>>, vector<16x16xf32>
    %c0_1 = arith.constant 0 : index
    %c16 = arith.constant 16 : index
    %1 = vector.load %arg1[%c0_1, %c16] : memref<16x32xf32, #tpu.memory_space<vmem>>, vector<16x16xf32>
    %2 = arith.negf %1 : vector<16x16xf32>
    %3 = math.exp %2 : vector<16x16xf32>
    %cst = arith.constant 1.000000e+00 : f32
    %4 = vector.broadcast %cst : f32 to vector<16x16xf32>
    %5 = arith.addf %4, %3 : vector<16x16xf32>
    %6 = arith.divf %4, %5 : vector<16x16xf32>
    %7 = arith.mulf %1, %6 : vector<16x16xf32>
    %8 = arith.mulf %0, %7 : vector<16x16xf32>
    %c0_2 = arith.constant 0 : index
    %c0_3 = arith.constant 0 : index
    %9 = vector.load %arg2[%c0_2, %c0_3] : memref<16x16xf32, #tpu.memory_space<vmem>>, vector<16x16xf32>
    tpu.vector_store %arg2[%c0_2, %c0_3], %8 {strides = array<i32>} : memref<16x16xf32, #tpu.memory_space<vmem>>, vector<16x16xf32>,
    return
  }
  func.func @transform_0(%arg0: i32) -> (i32, i32) {
    %c0_i32 = arith.constant 0 : i32
    %c0_i32_0 = arith.constant 0 : i32
    return %arg0, %c0_i32 : i32, i32
  }
  func.func @transform_1(%arg0: i32) -> (i32, i32) {
    %c0_i32 = arith.constant 0 : i32
    %c0_i32_0 = arith.constant 0 : i32
    return %arg0, %c0_i32 : i32, i32
  }
}

</mosaic_0001>

<bundles_post_ra>
// kernel: tpu_custom_call.1
= control target key start
LH: loop header
LB: loop body
LE: loop exit
PB: predicated region body
PF: predicated region fallthrough
CT: control target
= control target key end

     0   :  { %6 = vsyncpa [#allocation3], 0  ;;  %s177_s0 = inlined_call_operand.hbm [shape: f32[16,32], index: 0, kind: input, shape index: {}]   ;;  %s178_s1 = inlined_call_operand.hbm [shape: f32[16,16], index: 1, kind: output, shape index: {}]  }
   0x1   :  { %7 = vsyncpa [#allocation4], 0  ;;  %s132_s6 = smov [#allocation2]   ;;  %s84_s10 = scalar_lea.hbm %s177_s0, 256 }
   0x2   :  { %s13_s7 = sshll.u32 %s132_s6, 4  ;;  %p85_p0 = scmp.ne.s32.totalorder %s177_s0, %s84_s10  ;;  %s14_s7 = int_to_ptr.vmem [resolvable:$true] %s13_s7 }
   0x3   :  { %p88_p1 = scmp.lt.u32.totalorder %s84_s10, %s177_s0 }
   0x5   :  { %p90_p2 = pnand %p88_p1, %p85_p0 }
   0x7   :  { %93 = shalt.err (!%p90_p2)
}
   0x8   :  { %s94_s15 = scalar_lea.vmem %s14_s7, 256  ;;  %p99_p4 = scmp.lt.s32.totalorder %s14_s7, %s14_s7 }
   0x9   :  { %p95_p3 = scmp.ne.s32.totalorder %s14_s7, %s94_s15  ;;  %p100_p5 = scmp.lt.s32.totalorder %s94_s15, %s94_s15 }
   0xb   :  { %p101_p6 = por %p100_p5, %p99_p4 }
   0xd   :  { %p102_p7 = pnand %p101_p6, %p95_p3 }
   0xf   :  { %105 = shalt.err (!%p102_p7)
}
  0x10   :  { %s133_s16 = smov 128   ;;  %s134_s17 = smov 8  }
  0x11   :  { %19 = dma.hbm_to_vmem [thread:$0]  %s177_s0, 256, %s14_s7, [#allocation3], %s133_s16, %s133_s16, %s134_s17  }
  0x12   :  { %128 = dma.done.wait [#allocation3], 256  }
  0x13   :  { %129 = vsyncadd [#allocation3], 4294967040  ;;  %v23_v0 = vld [vmem:[#allocation2] sm:$0xff]  ;;  %v24_v1 = vld [vmem:[#allocation2 + $0x8] sm:$0xff]  ;;  %s135_s20 = smov 112   ;;  %vm49_vm0 = vcmask 130048  }
  0x14   :  { %v69_v2 = vmul.f32 -1.442695, %v23_v0  ;;  %v70_v3 = vmul.f32 -1.442695, %v24_v1  ;;  %s136_s0 = smov [#allocation5]  }
  0x15   :  { %s57_s21 = sshll.u32 %s136_s0, 4  ;;  %s58_s21 = int_to_ptr.vmem [resolvable:$true] %s57_s21 }
  0x16   :  { %76 = vpow2.f32 %v69_v2  ;;  %s106_s22 = scalar_lea.vmem %s58_s21, 256  ;;  %p111_p9 = scmp.lt.s32.totalorder %s58_s21, %s58_s21 }
  0x17   :  { %78 = vpow2.f32 %v70_v3  ;;  %p107_p8 = scmp.ne.s32.totalorder %s58_s21, %s106_s22  ;;  %p112_p10 = scmp.lt.s32.totalorder %s106_s22, %s106_s22 }
  0x19   :  { %p113_p11 = por %p112_p10, %p111_p9 }
  0x1b   :  { %p114_p12 = pnand %p113_p11, %p107_p8 }
  0x20   :  { %v77_v4 = vpop.eup %76 }
  0x21   :  { %v79_v5 = vpop.eup %78  ;;  %v31_v6 = vadd.f32 1.0, %v77_v4 }
  0x22   :  { %v32_v7 = vadd.f32 1.0, %v79_v5 }
  0x23   :  { %80 = vrcp.f32 %v31_v6 }
  0x24   :  { %82 = vrcp.f32 %v32_v7 }
  0x2d   :  { %v81_v8 = vpop.eup %80 }
  0x2e   :  { %v83_v9 = vpop.eup %82  ;;  %v37_v10 = vmul.f32 %v81_v8, %v23_v0 }
  0x2f   :  { %v38_v11 = vmul.f32 %v83_v9, %v24_v1 }
  0x30   :  { %41 = vrot.lane.b32.xlu0 %v37_v10, %s135_s20 }
  0x34   :  { %43 = vrot.lane.b32.xlu0 %v38_v11, %s135_s20 }
  0xa2   :  { %v42_v12 = vpop.permute.xlu0 %41 }
  0xa3   :  { %v47_v13 = vmul.f32 %v42_v12, %v23_v0 }
  0xa5   :  { %50 = vst.msk [vmem:[#allocation5] sm:$0xff] %vm49_vm0, %v47_v13 }
  0xa6   :  { %v44_v14 = vpop.permute.xlu0 %43 }
  0xa7   :  { %v48_v15 = vmul.f32 %v44_v14, %v24_v1 }
  0xa9   :  { %51 = vst.msk [vmem:[#allocation5 + $0x8] sm:$0xff] %vm49_vm0, %v48_v15 }
  0xaa   :  { %117 = shalt.err (!%p114_p12)
}
  0xab   :  { %s118_s25 = scalar_lea.hbm %s178_s1, 256 }
  0xac   :  { %p119_p13 = scmp.ne.s32.totalorder %s178_s1, %s118_s25  ;;  %p122_p0 = scmp.lt.u32.totalorder %s118_s25, %s178_s1 }
  0xae   :  { %p124_p1 = pnand %p122_p0, %p119_p13 }
  0xb0   :  { %127 = shalt.err (!%p124_p1)
}
  0xb1   :  { %63 = dma.vmem_to_hbm [thread:$0]  %s58_s21, 256, %s178_s1, [#allocation4], %s133_s16, %s133_s16, %s134_s17  }
  0xb2   :  { %130 = dma.done.wait [#allocation4], 256  }
  0xb3   :  { %131 = vsyncadd [#allocation4], 4294967040 }
  0xb4   :  { %67 = vsyncpa [#allocation3], 1 }
  0xb5   :  { %68 = vsyncpa [#allocation4], 1 }

</bundles_post_ra>
